<compile_context>
chip_gen: v7x
topology: tpu7x:2x2x1
jax: 0.10.0
libtpu: 0.0.40
codegen_flags: <defaults>
</compile_context>

<pallas_src>
import functools

import jax
import jax.numpy as jnp
from jax import lax
from jax.experimental import pallas as pl
from jax.experimental.pallas import tpu as pltpu


def _avg_pool_h(stats, window_size, num_heights):
    """avg_pool1d over the H (sublane) axis of (A, 1, H, 1) f32 stat tensors.

    kernel=window_size, stride=1, padding=window_size // 2,
    count_include_pad=False.  Only output rows 0..H-1 are produced, which is
    exactly what the torch module keeps (it trims the extra trailing row that
    avg_pool1d emits for even window sizes).
    """
    k, H = window_size, num_heights
    p = k // 2
    lo, hi = -p, k - 1 - p                        # window = source rows [h+lo, h+hi]
    hpos = lax.broadcasted_iota(jnp.int32, (1, 1, H, 1), 2)
    accs = list(stats)                            # center (offset 0) tap
    cnt = jnp.ones((1, 1, H, 1), jnp.float32)
    for r in range(1, max(-lo, hi) + 1):
        for shift in (r, -r):
            sh = shift % H
            # True source row of every output row for this roll (robust to the
            # roll direction convention); masks out wrapped rows and rows
            # outside the pooling window -> count_include_pad=False for free.
            src = pltpu.roll(hpos, shift=sh, axis=2)
            off = src - hpos
            m = ((off >= lo) & (off <= hi)).astype(jnp.float32)
            cnt = cnt + m
            for i, s in enumerate(stats):
                accs[i] = accs[i] + pltpu.roll(s, shift=sh, axis=2) * m
    inv_cnt = 1.0 / cnt                           # tiny (1,1,H,1) divide
    return tuple(a * inv_cnt for a in accs)


def _groupnorm1d_kernel(x_ref, w_ref, b_ref, o_ref, *, window_size, eps, affine):
    A, cg, H, W = x_ref.shape                     # A = batch_block * num_groups

    x = x_ref[...]
    xf = x.astype(jnp.float32)                    # no-op for f32 inputs

    # --- single-pass per-channel statistics over the window axis W (lanes) ---
    mean_c = jnp.mean(xf, axis=-1, keepdims=True)            # (A, cg, H, 1)
    msq_c = jnp.mean(xf * xf, axis=-1, keepdims=True)        # E[x^2], f32 acc
    var_c = msq_c - mean_c * mean_c                          # biased variance

    # --- average over the channels-per-group axis -----------------------------
    # Unrolled over the small static `cg` axis; this touches only the tiny
    # (A,1,H,1) stats -- the full-tile normalize/store below is one vector op.
    gm = mean_c[:, 0:1]
    gv = var_c[:, 0:1]
    for j in range(1, cg):
        gm = gm + mean_c[:, j:j + 1]
        gv = gv + var_c[:, j:j + 1]
    inv_cg = 1.0 / cg
    gm = gm * inv_cg                                          # (A, 1, H, 1)
    gv = gv * inv_cg

    # --- avg_pool1d smoothing along H (commutes with the group average) -------
    if window_size > 1:
        gm, gv = _avg_pool_h((gm, gv), window_size, H)

    gv = jnp.maximum(gv, 0.0)                # guard one-pass cancellation
    inv = lax.rsqrt(gv + eps)                # EUP rsqrt on tiny (A,1,H,1)

    # y = (x - gm) * inv * w + b  ==  x * scale + shift   (broadcast over W)
    if affine:
        scale = w_ref[...] * inv                              # (A, cg, H, 1)
        shift = b_ref[...] - gm * scale
    else:
        scale = inv
        shift = -(gm * inv)

    # single full-block store
    o_ref[...] = (xf * scale + shift).astype(o_ref.dtype)


def _pick_batch_block(B, per_batch_bytes, *, target_bytes=4 << 20,
                      min_block_bytes=256 << 10):
    """Largest batch tile whose x-block stays under `target_bytes`.

    Prefers >= 2 grid steps (megacore sharding on v7x) when each step is still
    big enough to amortize the ~0.35us per-step pipeline overhead.
    """
    divisors = [d for d in range(1, B + 1) if B % d == 0]
    under = [d for d in divisors if d * per_batch_bytes <= target_bytes] or [1]
    bt = max(under)
    parallel = [d for d in under
                if d <= B // 2 and d * per_batch_bytes >= min_block_bytes]
    if bt == B and parallel:
        bt = max(parallel)
    return bt


def groupnorm1d(x, weight=None, bias=None, *, num_groups, window_size,
                eps=1e-5, affine=True, batch_block=None):
    B, C, H, W = x.shape
    assert C % num_groups == 0, "num_channels must be divisible by num_groups"
    # pooling window must fit comfortably inside H (typical: 3..7 vs H >= 16)
    assert window_size == 1 or 2 * (window_size // 2) < H
    G = num_groups
    cg = C // G

    per_batch_bytes = C * H * W * x.dtype.itemsize
    if batch_block is None:
        batch_block = _pick_batch_block(B, per_batch_bytes)
    Bt = batch_block
    assert B % Bt == 0
    A = Bt * G                                   # leading rows per block

    # (B, C, H, W) -> (B*G, cg, H, W): contiguous reshape, free in XLA.
    x_r = x.reshape(B * G, cg, H, W)

    use_affine = affine and weight is not None and bias is not None
    if use_affine:
        w_t = jnp.tile(weight.astype(jnp.float32).reshape(G, cg, H), (Bt, 1, 1))
        b_t = jnp.tile(bias.astype(jnp.float32).reshape(G, cg, H), (Bt, 1, 1))
    else:
        w_t = jnp.ones((A, cg, H), jnp.float32)
        b_t = jnp.zeros((A, cg, H), jnp.float32)
    w_t = w_t.reshape(A, cg, H, 1)
    b_t = b_t.reshape(A, cg, H, 1)

    grid = (B // Bt,)
    block_bytes = A * cg * H * W * x.dtype.itemsize
    # in+out double-buffered plus f32 temporaries; clamp for v7x's 64 MiB VMEM.
    vmem_limit = int(min(max(8 * block_bytes, 32 << 20), 48 << 20))

    kernel = functools.partial(
        _groupnorm1d_kernel,
        window_size=window_size, eps=eps, affine=use_affine)

    out = pl.pallas_call(
        kernel,
        out_shape=jax.ShapeDtypeStruct((B * G, cg, H, W), x.dtype),
        grid=grid,
        in_specs=[
            pl.BlockSpec((A, cg, H, W), lambda i: (i, 0, 0, 0)),
            pl.BlockSpec((A, cg, H, 1), lambda i: (0, 0, 0, 0)),
            pl.BlockSpec((A, cg, H, 1), lambda i: (0, 0, 0, 0)),
        ],
        out_specs=pl.BlockSpec((A, cg, H, W), lambda i: (i, 0, 0, 0)),
        compiler_params=pltpu.CompilerParams(
            dimension_semantics=("parallel",),
            vmem_limit_bytes=vmem_limit),
    )(x_r, w_t, b_t)
    return out.reshape(B, C, H, W)


def _reference(x, weight, bias, *, num_groups, window_size, eps, affine):
    """Pure-JAX re-implementation of the torch forward, for validation."""
    B, C, H, W = x.shape
    xf = x.astype(jnp.float32)
    mean = xf.mean(-1)                                        # (B, C, H)
    var = ((xf - mean[..., None]) ** 2).mean(-1)              # biased
    if window_size > 1:
        p = window_size // 2
        j = jnp.arange(H)[:, None]                            # input row
        h = jnp.arange(H)[None, :]                            # output row
        mask = ((j >= h - p) & (j <= h - p + window_size - 1)).astype(jnp.float32)
        pool_t = mask / mask.sum(0, keepdims=True)            # count_include_pad=False
        hp = jax.lax.Precision.HIGHEST
        mean = jnp.matmul(mean, pool_t, precision=hp)
        var = jnp.matmul(var, pool_t, precision=hp)
    cg = C // num_groups
    gm = mean.reshape(B, num_groups, cg, H).mean(2, keepdims=True)
    gv = var.reshape(B, num_groups, cg, H).mean(2, keepdims=True)
    y = (xf.reshape(B, num_groups, cg, H, W) - gm[..., None]) / jnp.sqrt(
        gv[..., None] + eps)
    y = y.reshape(B, C, H, W)
    if affine:
        y = y * weight[None, :, :, None] + bias[None, :, :, None]
    return y.astype(x.dtype)


if __name__ == "__main__":
    # Module config: GroupNorm1D(num_groups=2, window_size=3, num_heights=16,
    #                            num_channels=4)
    num_groups, window_size, num_heights, num_channels = 2, 3, 16, 4
    eps, affine = 1e-5, True
    B, W = 2, 16

    key = jax.random.PRNGKey(0)
    kx, kw, kb = jax.random.split(key, 3)
    x = jax.random.normal(kx, (B, num_channels, num_heights, W), dtype=jnp.float32)
    # reset_parameters() sets weight=1, bias=0; perturb deterministically so the
    # affine path is actually exercised.
    weight = 1.0 + 0.1 * jax.random.normal(kw, (num_channels, num_heights),
                                           dtype=jnp.float32)
    bias = 0.1 * jax.random.normal(kb, (num_channels, num_heights),
                                   dtype=jnp.float32)

    out = groupnorm1d(x, weight, bias,
                      num_groups=num_groups, window_size=window_size,
                      eps=eps, affine=affine)
    out = jax.block_until_ready(out)

    ref = _reference(x, weight, bias,
                     num_groups=num_groups, window_size=window_size,
                     eps=eps, affine=affine)
    assert out.shape == x.shape and out.dtype == x.dtype
    assert jnp.allclose(out, ref, rtol=1e-5, atol=1e-5), "mismatch vs reference"

    print("KERNEL_OK")
</pallas_src>

<mosaic_0001>
module attributes {stable_mosaic.version = 11 : i64} {
  func.func @_groupnorm1d_kernel(%arg0: i32, %arg1: memref<4x2x16x16xf32, #tpu.memory_space<vmem>>, %arg2: memref<4x2x16x1xf32, #tpu.memory_space<vmem>>, %arg3: memref<4x2x16x1xf32, #tpu.memory_space<vmem>>, %arg4: memref<4x2x16x16xf32, #tpu.memory_space<vmem>>) attributes {dimension_semantics = [#tpu.dimension_semantics<parallel>], iteration_bounds = array<i64: 1>, scalar_prefetch = 0 : i64, scratch_operands = 0 : i64, tpu.core_type = #tpu.core_type<tc>, window_params = [{transform_indices = @transform_0, window_bounds = array<i64: 4, 2, 16, 16>}, {pipeline_mode = #tpu.pipeline_mode<synchronous>, transform_indices = @transform_1, window_bounds = array<i64: 4, 2, 16, 1>}, {pipeline_mode = #tpu.pipeline_mode<synchronous>, transform_indices = @transform_2, window_bounds = array<i64: 4, 2, 16, 1>}, {transform_indices = @transform_3, window_bounds = array<i64: 4, 2, 16, 16>}]} {
    %c0 = arith.constant 0 : index
    %c0_0 = arith.constant 0 : index
    %c0_1 = arith.constant 0 : index
    %c0_2 = arith.constant 0 : index
    %0 = vector.load %arg1[%c0, %c0_0, %c0_1, %c0_2] : memref<4x2x16x16xf32, #tpu.memory_space<vmem>>, vector<4x2x16x16xf32>
    %cst = arith.constant dense<0.000000e+00> : vector<4x2x16xf32>
    %1 = vector.multi_reduction <add>, %0, %cst [3] : vector<4x2x16x16xf32> to vector<4x2x16xf32>
    %2 = vector.shape_cast %1 : vector<4x2x16xf32> to vector<4x2x16x1xf32>
    %cst_3 = arith.constant 1.600000e+01 : f32
    %3 = vector.broadcast %cst_3 : f32 to vector<4x2x16x1xf32>
    %4 = arith.divf %2, %3 : vector<4x2x16x1xf32>
    %5 = arith.mulf %0, %0 : vector<4x2x16x16xf32>
    %cst_4 = arith.constant dense<0.000000e+00> : vector<4x2x16xf32>
    %6 = vector.multi_reduction <add>, %5, %cst_4 [3] : vector<4x2x16x16xf32> to vector<4x2x16xf32>
    %7 = vector.shape_cast %6 : vector<4x2x16xf32> to vector<4x2x16x1xf32>
    %cst_5 = arith.constant 1.600000e+01 : f32
    %8 = vector.broadcast %cst_5 : f32 to vector<4x2x16x1xf32>
    %9 = arith.divf %7, %8 : vector<4x2x16x1xf32>
    %10 = arith.mulf %4, %4 : vector<4x2x16x1xf32>
    %11 = arith.subf %9, %10 : vector<4x2x16x1xf32>
    %12 = vector.extract_strided_slice %4 {offsets = [0, 0, 0, 0], sizes = [4, 1, 16, 1], strides = [1, 1, 1, 1]} : vector<4x2x16x1xf32> to vector<4x1x16x1xf32>
    %13 = vector.extract_strided_slice %11 {offsets = [0, 0, 0, 0], sizes = [4, 1, 16, 1], strides = [1, 1, 1, 1]} : vector<4x2x16x1xf32> to vector<4x1x16x1xf32>
    %14 = vector.extract_strided_slice %4 {offsets = [0, 1, 0, 0], sizes = [4, 1, 16, 1], strides = [1, 1, 1, 1]} : vector<4x2x16x1xf32> to vector<4x1x16x1xf32>
    %15 = arith.addf %12, %14 : vector<4x1x16x1xf32>
    %16 = vector.extract_strided_slice %11 {offsets = [0, 1, 0, 0], sizes = [4, 1, 16, 1], strides = [1, 1, 1, 1]} : vector<4x2x16x1xf32> to vector<4x1x16x1xf32>
    %17 = arith.addf %13, %16 : vector<4x1x16x1xf32>
    %cst_6 = arith.constant 5.000000e-01 : f32
    %18 = vector.broadcast %cst_6 : f32 to vector<4x1x16x1xf32>
    %19 = arith.mulf %15, %18 : vector<4x1x16x1xf32>
    %cst_7 = arith.constant 5.000000e-01 : f32
    %20 = vector.broadcast %cst_7 : f32 to vector<4x1x16x1xf32>
    %21 = arith.mulf %17, %20 : vector<4x1x16x1xf32>
    %22 = tpu.iota {dimensions = array<i32: 2>} : vector<1x1x16x1xi32>
    %cst_8 = arith.constant 1.000000e+00 : f32
    %23 = vector.broadcast %cst_8 : f32 to vector<1x1x16x1xf32>
    %c1_i32 = arith.constant 1 : i32
    %24 = tpu.dynamic_rotate %22 by %c1_i32 dim 2 : vector<1x1x16x1xi32>, i32 -> vector<1x1x16x1xi32>
    %25 = arith.subi %24, %22 : vector<1x1x16x1xi32>
    %c-1_i32 = arith.constant -1 : i32
    %26 = vector.broadcast %c-1_i32 : i32 to vector<1x1x16x1xi32>
    %27 = arith.cmpi sge, %25, %26 : vector<1x1x16x1xi32>
    %c1_i32_9 = arith.constant 1 : i32
    %28 = vector.broadcast %c1_i32_9 : i32 to vector<1x1x16x1xi32>
    %29 = arith.cmpi sle, %25, %28 : vector<1x1x16x1xi32>
    %30 = arith.andi %27, %29 : vector<1x1x16x1xi1>
    %31 = arith.extui %30 : vector<1x1x16x1xi1> to vector<1x1x16x1xi32>
    %32 = arith.sitofp %31 : vector<1x1x16x1xi32> to vector<1x1x16x1xf32>
    %33 = arith.addf %23, %32 : vector<1x1x16x1xf32>
    %c1_i32_10 = arith.constant 1 : i32
    %34 = tpu.dynamic_rotate %19 by %c1_i32_10 dim 2 : vector<4x1x16x1xf32>, i32 -> vector<4x1x16x1xf32>
    %35 = vector.broadcast %32 : vector<1x1x16x1xf32> to vector<4x1x16x1xf32>
    %36 = arith.mulf %34, %35 : vector<4x1x16x1xf32>
    %37 = arith.addf %19, %36 : vector<4x1x16x1xf32>
    %c1_i32_11 = arith.constant 1 : i32
    %38 = tpu.dynamic_rotate %21 by %c1_i32_11 dim 2 : vector<4x1x16x1xf32>, i32 -> vector<4x1x16x1xf32>
    %39 = vector.broadcast %32 : vector<1x1x16x1xf32> to vector<4x1x16x1xf32>
    %40 = arith.mulf %38, %39 : vector<4x1x16x1xf32>
    %41 = arith.addf %21, %40 : vector<4x1x16x1xf32>
    %c15_i32 = arith.constant 15 : i32
    %42 = tpu.dynamic_rotate %22 by %c15_i32 dim 2 : vector<1x1x16x1xi32>, i32 -> vector<1x1x16x1xi32>
    %43 = arith.subi %42, %22 : vector<1x1x16x1xi32>
    %c-1_i32_12 = arith.constant -1 : i32
    %44 = vector.broadcast %c-1_i32_12 : i32 to vector<1x1x16x1xi32>
    %45 = arith.cmpi sge, %43, %44 : vector<1x1x16x1xi32>
    %c1_i32_13 = arith.constant 1 : i32
    %46 = vector.broadcast %c1_i32_13 : i32 to vector<1x1x16x1xi32>
    %47 = arith.cmpi sle, %43, %46 : vector<1x1x16x1xi32>
    %48 = arith.andi %45, %47 : vector<1x1x16x1xi1>
    %49 = arith.extui %48 : vector<1x1x16x1xi1> to vector<1x1x16x1xi32>
    %50 = arith.sitofp %49 : vector<1x1x16x1xi32> to vector<1x1x16x1xf32>
    %51 = arith.addf %33, %50 : vector<1x1x16x1xf32>
    %c15_i32_14 = arith.constant 15 : i32
    %52 = tpu.dynamic_rotate %19 by %c15_i32_14 dim 2 : vector<4x1x16x1xf32>, i32 -> vector<4x1x16x1xf32>
    %53 = vector.broadcast %50 : vector<1x1x16x1xf32> to vector<4x1x16x1xf32>
    %54 = arith.mulf %52, %53 : vector<4x1x16x1xf32>
    %55 = arith.addf %37, %54 : vector<4x1x16x1xf32>
    %c15_i32_15 = arith.constant 15 : i32
    %56 = tpu.dynamic_rotate %21 by %c15_i32_15 dim 2 : vector<4x1x16x1xf32>, i32 -> vector<4x1x16x1xf32>
    %57 = vector.broadcast %50 : vector<1x1x16x1xf32> to vector<4x1x16x1xf32>
    %58 = arith.mulf %56, %57 : vector<4x1x16x1xf32>
    %59 = arith.addf %41, %58 : vector<4x1x16x1xf32>
    %cst_16 = arith.constant 1.000000e+00 : f32
    %60 = vector.broadcast %cst_16 : f32 to vector<1x1x16x1xf32>
    %61 = arith.divf %60, %51 : vector<1x1x16x1xf32>
    %62 = vector.broadcast %61 : vector<1x1x16x1xf32> to vector<4x1x16x1xf32>
    %63 = arith.mulf %55, %62 : vector<4x1x16x1xf32>
    %64 = vector.broadcast %61 : vector<1x1x16x1xf32> to vector<4x1x16x1xf32>
    %65 = arith.mulf %59, %64 : vector<4x1x16x1xf32>
    %cst_17 = arith.constant 0.000000e+00 : f32
    %66 = vector.broadcast %cst_17 : f32 to vector<4x1x16x1xf32>
    %67 = arith.maximumf %65, %66 : vector<4x1x16x1xf32>
    %cst_18 = arith.constant 9.99999974E-6 : f32
    %68 = vector.broadcast %cst_18 : f32 to vector<4x1x16x1xf32>
    %69 = arith.addf %67, %68 : vector<4x1x16x1xf32>
    %70 = math.rsqrt %69 : vector<4x1x16x1xf32>
    %c0_19 = arith.constant 0 : index
    %c0_20 = arith.constant 0 : index
    %c0_21 = arith.constant 0 : index
    %c0_22 = arith.constant 0 : index
    %71 = vector.load %arg2[%c0_19, %c0_20, %c0_21, %c0_22] : memref<4x2x16x1xf32, #tpu.memory_space<vmem>>, vector<4x2x16x1xf32>
    %72 = vector.broadcast %70 : vector<4x1x16x1xf32> to vector<4x2x16x1xf32>
    %73 = arith.mulf %71, %72 : vector<4x2x16x1xf32>
    %c0_23 = arith.constant 0 : index
    %c0_24 = arith.constant 0 : index
    %c0_25 = arith.constant 0 : index
    %c0_26 = arith.constant 0 : index
    %74 = vector.load %arg3[%c0_23, %c0_24, %c0_25, %c0_26] : memref<4x2x16x1xf32, #tpu.memory_space<vmem>>, vector<4x2x16x1xf32>
    %75 = vector.broadcast %63 : vector<4x1x16x1xf32> to vector<4x2x16x1xf32>
    %76 = arith.mulf %75, %73 : vector<4x2x16x1xf32>
    %77 = arith.subf %74, %76 : vector<4x2x16x1xf32>
    %78 = vector.broadcast %73 : vector<4x2x16x1xf32> to vector<4x2x16x16xf32>
    %79 = arith.mulf %0, %78 : vector<4x2x16x16xf32>
    %80 = vector.broadcast %77 : vector<4x2x16x1xf32> to vector<4x2x16x16xf32>
    %81 = arith.addf %79, %80 : vector<4x2x16x16xf32>
    %c0_27 = arith.constant 0 : index
    %c0_28 = arith.constant 0 : index
    %c0_29 = arith.constant 0 : index
    %c0_30 = arith.constant 0 : index
    %82 = vector.load %arg4[%c0_27, %c0_28, %c0_29, %c0_30] : memref<4x2x16x16xf32, #tpu.memory_space<vmem>>, vector<4x2x16x16xf32>
    tpu.vector_store %arg4[%c0_27, %c0_28, %c0_29, %c0_30], %81 {strides = array<i32>} : memref<4x2x16x16xf32, #tpu.memory_space<vmem>>, vector<4x2x16x16xf32>,
    return
  }
  func.func @transform_0(%arg0: i32) -> (i32, i32, i32, i32) {
    %c0_i32 = arith.constant 0 : i32
    %c0_i32_0 = arith.constant 0 : i32
    %c0_i32_1 = arith.constant 0 : i32
    %c0_i32_2 = arith.constant 0 : i32
    return %arg0, %c0_i32, %c0_i32_0, %c0_i32_1 : i32, i32, i32, i32
  }
  func.func @transform_1(%arg0: i32) -> (i32, i32, i32, i32) {
    %c0_i32 = arith.constant 0 : i32
    %c0_i32_0 = arith.constant 0 : i32
    %c0_i32_1 = arith.constant 0 : i32
    %c0_i32_2 = arith.constant 0 : i32
    %c0_i32_3 = arith.constant 0 : i32
    return %c0_i32, %c0_i32_0, %c0_i32_1, %c0_i32_2 : i32, i32, i32, i32
  }
  func.func @transform_2(%arg0: i32) -> (i32, i32, i32, i32) {
    %c0_i32 = arith.constant 0 : i32
    %c0_i32_0 = arith.constant 0 : i32
    %c0_i32_1 = arith.constant 0 : i32
    %c0_i32_2 = arith.constant 0 : i32
    %c0_i32_3 = arith.constant 0 : i32
    return %c0_i32, %c0_i32_0, %c0_i32_1, %c0_i32_2 : i32, i32, i32, i32
  }
  func.func @transform_3(%arg0: i32) -> (i32, i32, i32, i32) {
    %c0_i32 = arith.constant 0 : i32
    %c0_i32_0 = arith.constant 0 : i32
    %c0_i32_1 = arith.constant 0 : i32
    %c0_i32_2 = arith.constant 0 : i32
    return %arg0, %c0_i32, %c0_i32_0, %c0_i32_1 : i32, i32, i32, i32
  }
}

</mosaic_0001>

<bundles_post_ra>
// kernel: tpu_custom_call.1
= control target key start
LH: loop header
LB: loop body
LE: loop exit
PB: predicated region body
PF: predicated region fallthrough
CT: control target
= control target key end

     0   :  { %vm31_vm0 = vcmask 130048   ;;  %s1517_s0 = inlined_call_operand.vmem [shape: f32[4,2,16,16], index: 0, kind: input, shape index: {}]   ;;  %s1518_s1 = inlined_call_operand.vmem [shape: f32[4,2,16,1], index: 1, kind: input, shape index: {}]   ;;  %s1519_s2 = inlined_call_operand.vmem [shape: f32[4,2,16,1], index: 2, kind: input, shape index: {}]   ;;  %s1520_s3 = inlined_call_operand.hbm [shape: f32[4,2,16,16], index: 3, kind: output, shape index: {}]  }
   0x1   :  { %v17_v0 = vld [vmem:[%s1517_s0 + $0x10] sm:$0xff]  ;;  %v15_v1 = vld [vmem:[%s1517_s0] sm:$0xff]  ;;  %v18_v2 = vld [vmem:[%s1517_s0 + $0x18] sm:$0xff] }
   0x2   :  { %v38_v3 = vsel %vm31_vm0, %v17_v0, 0.0  ;;  %v32_v4 = vsel %vm31_vm0, %v15_v1, 0.0  ;;  %v16_v5 = vld [vmem:[%s1517_s0 + $0x8] sm:$0xff]  ;;  %v41_v6 = vsel %vm31_vm0, %v18_v2, 0.0  ;;  %v19_v9 = vld [vmem:[%s1517_s0 + $0x20] sm:$0xff] }
   0x3   :  { %39 = vadd.xlane.f32.xlu1 %v38_v3  ;;  %33 = vadd.xlane.f32.xlu0 %v32_v4  ;;  %v35_v7 = vsel %vm31_vm0, %v16_v5, 0.0  ;;  %v20_v8 = vld [vmem:[%s1517_s0 + $0x28] sm:$0xff] }
   0x7   :  { %42 = vadd.xlane.f32.xlu1 %v41_v6  ;;  %36 = vadd.xlane.f32.xlu0 %v35_v7 }
   0x8   :  { %8 = vsyncpa [#allocation3], 0  ;;  %v47_v10 = vsel %vm31_vm0, %v20_v8, 0.0  ;;  %v44_v11 = vsel %vm31_vm0, %v19_v9, 0.0  ;;  %v22_v12 = vld [vmem:[%s1517_s0 + $0x38] sm:$0xff]  ;;  %v21_v13 = vld [vmem:[%s1517_s0 + $0x30] sm:$0xff]  ;;  %v98_v32 = vmul.f32 %v16_v5, %v16_v5  ;;  %v97_v33 = vmul.f32 %v15_v1, %v15_v1 }
   0x9   :  { %v53_v14 = vsel %vm31_vm0, %v22_v12, 0.0  ;;  %v50_v15 = vsel %vm31_vm0, %v21_v13, 0.0  ;;  %v24_v16 = vld [vmem:[%s1517_s0 + $0x48] sm:$0xff]  ;;  %v23_v17 = vld [vmem:[%s1517_s0 + $0x40] sm:$0xff]  ;;  %v26_v20 = vld [vmem:[%s1517_s0 + $0x58] sm:$0xff]  ;;  %v100_v36 = vmul.f32 %v18_v2, %v18_v2  ;;  %v99_v37 = vmul.f32 %v17_v0, %v17_v0  ;;  %s831_s27 = smov [#allocation2]  }
   0xa   :  { %v59_v18 = vsel %vm31_vm0, %v24_v16, 0.0  ;;  %v56_v19 = vsel %vm31_vm0, %v23_v17, 0.0  ;;  %v25_v21 = vld [vmem:[%s1517_s0 + $0x50] sm:$0xff]  ;;  %v65_v22 = vsel %vm31_vm0, %v26_v20, 0.0  ;;  %v28_v24 = vld [vmem:[%s1517_s0 + $0x68] sm:$0xff]  ;;  %v27_v25 = vld [vmem:[%s1517_s0 + $0x60] sm:$0xff]  ;;  %v102_v40 = vmul.f32 %v20_v8, %v20_v8 }
   0xb   :  { %48 = vadd.xlane.f32.xlu1 %v47_v10  ;;  %45 = vadd.xlane.f32.xlu0 %v44_v11  ;;  %v62_v23 = vsel %vm31_vm0, %v25_v21, 0.0  ;;  %v71_v26 = vsel %vm31_vm0, %v28_v24, 0.0  ;;  %v68_v27 = vsel %vm31_vm0, %v27_v25, 0.0  ;;  %v30_v28 = vld [vmem:[%s1517_s0 + $0x78] sm:$0xff]  ;;  %v29_v29 = vld [vmem:[%s1517_s0 + $0x70] sm:$0xff]  ;;  %v116_v34 = vsel %vm31_vm0, %v98_v32, 0.0 }
   0xc   :  { %v77_v30 = vsel %vm31_vm0, %v30_v28, 0.0  ;;  %v74_v31 = vsel %vm31_vm0, %v29_v29, 0.0  ;;  %v113_v35 = vsel %vm31_vm0, %v97_v33, 0.0  ;;  %v122_v38 = vsel %vm31_vm0, %v100_v36, 0.0 }
   0xd   :  { %v119_v39 = vsel %vm31_vm0, %v99_v37, 0.0  ;;  %v101_v41 = vmul.f32 %v19_v9, %v19_v9  ;;  %v128_v42 = vsel %vm31_vm0, %v102_v40, 0.0  ;;  %v104_v44 = vmul.f32 %v22_v12, %v22_v12 }
   0xe   :  { %v103_v45 = vmul.f32 %v21_v13, %v21_v13  ;;  %v106_v48 = vmul.f32 %v24_v16, %v24_v16  ;;  %v105_v49 = vmul.f32 %v23_v17, %v23_v17  ;;  %v108_v52 = vmul.f32 %v26_v20, %v26_v20 }
   0xf   :  { %54 = vadd.xlane.f32.xlu1 %v53_v14  ;;  %51 = vadd.xlane.f32.xlu0 %v50_v15  ;;  %v125_v43 = vsel %vm31_vm0, %v101_v41, 0.0  ;;  %v134_v46 = vsel %vm31_vm0, %v104_v44, 0.0  ;;  %v107_v53 = vmul.f32 %v25_v21, %v25_v21  ;;  %v110_v56 = vmul.f32 %v28_v24, %v28_v24 }
  0x10   :  { %v131_v47 = vsel %vm31_vm0, %v103_v45, 0.0  ;;  %v140_v50 = vsel %vm31_vm0, %v106_v48, 0.0  ;;  %v137_v51 = vsel %vm31_vm0, %v105_v49, 0.0  ;;  %v146_v54 = vsel %vm31_vm0, %v108_v52, 0.0 }
  0x11   :  { %v143_v55 = vsel %vm31_vm0, %v107_v53, 0.0  ;;  %v109_v57 = vmul.f32 %v27_v25, %v27_v25  ;;  %v152_v58 = vsel %vm31_vm0, %v110_v56, 0.0  ;;  %v112_v60 = vmul.f32 %v30_v28, %v30_v28 }
  0x12   :  { %v111_v61 = vmul.f32 %v29_v29, %v29_v29  ;;  %v829_v0 = vmov 0   ;;  %v241_v1 = vlaneseq }
  0x13   :  { %60 = vadd.xlane.f32.xlu1 %v59_v18  ;;  %57 = vadd.xlane.f32.xlu0 %v56_v19  ;;  %v149_v59 = vsel %vm31_vm0, %v109_v57, 0.0  ;;  %v158_v62 = vsel %vm31_vm0, %v112_v60, 0.0 }
  0x14   :  { %v155_v63 = vsel %vm31_vm0, %v111_v61, 0.0  ;;  %768 = vset.pattern.permute.xlu1 %v829_v0  ;;  %767 = vset.pattern.permute.xlu0 %v829_v0  ;;  %v934_v4 = vshrl.u32 %v241_v1, 7 }
  0x16   :  { %v243_v7 = vadd.s32 8, %v934_v4  ;;  %v244_v10 = vrot.slane %v934_v4, 7  ;;  %vm246_vm1 = vcmp.lt.s32.totalorder %v934_v4, 1  ;;  %v327_v15 = vrot.slane %v934_v4, 1 }
  0x17   :  { %66 = vadd.xlane.f32.xlu1 %v65_v22  ;;  %63 = vadd.xlane.f32.xlu0 %v62_v23  ;;  %vm329_vm2 = vcmp.lt.s32.totalorder %v934_v4, 7 }
  0x18   :  { %v245_v11 = vrot.slane %v243_v7, 7  ;;  %v328_v16 = vrot.slane %v243_v7, 1 }
  0x1a   :  { %v247_v14 = vsel %vm246_vm1, %v244_v10, %v245_v11  ;;  %v248_v17 = vsel %vm246_vm1, %v245_v11, %v244_v10  ;;  %v331_v22 = vsel %vm329_vm2, %v328_v16, %v327_v15  ;;  %v330_v23 = vsel %vm329_vm2, %v327_v15, %v328_v16 }
  0x1b   :  { %72 = vadd.xlane.f32.xlu1 %v71_v26  ;;  %69 = vadd.xlane.f32.xlu0 %v68_v27  ;;  %v250_v20 = vsub.s32 %v247_v14, %v243_v7  ;;  %v249_v21 = vsub.s32 %v248_v17, %v934_v4  ;;  %v333_v26 = vsub.s32 %v331_v22, %v243_v7 }
  0x1c   :  { %v332_v27 = vsub.s32 %v330_v23, %v934_v4  ;;  %v494_v4 = vld [vmem:[%s1519_s2 + $0x40] sm:$0xff] }
  0x1d   :  { %vm252_vm3 = vcmp.ge.s32.totalorder %v250_v20, 4294967295  ;;  %vm254_vm4 = vcmp.le.s32.totalorder %v250_v20, 1  ;;  %vm251_vm5 = vcmp.ge.s32.totalorder %v249_v21, 4294967295  ;;  %vm253_vm6 = vcmp.le.s32.totalorder %v249_v21, 1 }
  0x1e   :  { %vm256_vm7 = vmand %vm252_vm3, %vm254_vm4  ;;  %vm335_vm9 = vcmp.ge.s32.totalorder %v333_v26, 4294967295  ;;  %vm337_vm10 = vcmp.le.s32.totalorder %v333_v26, 1  ;;  %vm334_vm11 = vcmp.ge.s32.totalorder %v332_v27, 4294967295  ;;  %vm336_vm12 = vcmp.le.s32.totalorder %v332_v27, 1 }
  0x1f   :  { %78 = vadd.xlane.f32.xlu1 %v77_v30  ;;  %75 = vadd.xlane.f32.xlu0 %v74_v31  ;;  %vm255_vm8 = vmand %vm251_vm5, %vm253_vm6  ;;  %v830_v30 = vmov 0.0  }
  0x20   :  { %v959_v31 = vsel %vm256_vm7, 1.0, %v830_v30  ;;  %vm339_vm13 = vmand %vm335_vm9, %vm337_vm10 }
  0x21   :  { %vm338_vm14 = vmand %vm334_vm11, %vm336_vm12 }
  0x23   :  { %117 = vadd.xlane.f32.xlu1 %v116_v34  ;;  %114 = vadd.xlane.f32.xlu0 %v113_v35  ;;  %v965_v34 = vsel %vm255_vm8, 1.0, %v830_v30  ;;  %v262_v35 = vadd.f32 1.0, %v959_v31 }
  0x24   :  { %v261_v37 = vadd.f32 1.0, %v965_v34 }
  0x27   :  { %123 = vadd.xlane.f32.xlu1 %v122_v38  ;;  %120 = vadd.xlane.f32.xlu0 %v119_v39  ;;  %v971_v38 = vsel %vm339_vm13, 1.0, %v830_v30 }
  0x28   :  { %v345_v45 = vadd.f32 %v971_v38, %v262_v35 }
  0x2a   :  { %769 = vrcp.f32 %v345_v45 }
  0x2b   :  { %129 = vadd.xlane.f32.xlu1 %v128_v42  ;;  %126 = vadd.xlane.f32.xlu0 %v125_v43  ;;  %v975_v42 = vsel %vm338_vm14, 1.0, %v830_v30 }
  0x2c   :  { %v344_v49 = vadd.f32 %v975_v42, %v261_v37 }
  0x2e   :  { %771 = vrcp.f32 %v344_v49 }
  0x2f   :  { %135 = vadd.xlane.f32.xlu1 %v134_v46  ;;  %132 = vadd.xlane.f32.xlu0 %v131_v47 }
  0x33   :  { %141 = vadd.xlane.f32.xlu1 %v140_v50  ;;  %138 = vadd.xlane.f32.xlu0 %v137_v51 }
  0x37   :  { %147 = vadd.xlane.f32.xlu1 %v146_v54  ;;  %144 = vadd.xlane.f32.xlu0 %v143_v55 }
  0x3b   :  { %153 = vadd.xlane.f32.xlu1 %v152_v58  ;;  %150 = vadd.xlane.f32.xlu0 %v149_v59 }
  0x3f   :  { %159 = vadd.xlane.f32.xlu1 %v158_v62  ;;  %156 = vadd.xlane.f32.xlu0 %v155_v63 }
  0x90   :  { %v40_v2 = vpop.xlane.xlu1 %39  ;;  %v34_v3 = vpop.xlane.xlu0 %33 }
  0x91   :  { %v977_v43 = vmul.f32 0.0625, %v40_v2  ;;  %v979_v44 = vmul.f32 0.0625, %v34_v3 }
  0x93   :  { %v179_v57 = vmul.f32 %v977_v43, %v977_v43  ;;  %v177_v58 = vmul.f32 %v979_v44, %v979_v44 }
  0x94   :  { %v43_v5 = vpop.xlane.xlu1 %42  ;;  %v37_v6 = vpop.xlane.xlu0 %36 }
  0x95   :  { %v968_v36 = vmul.f32 0.0625, %v43_v5  ;;  %v973_v39 = vmul.f32 0.0625, %v37_v6 }
  0x97   :  { %v180_v47 = vmul.f32 %v968_v36, %v968_v36  ;;  %v178_v48 = vmul.f32 %v973_v39, %v973_v39 }
  0x98   :  { %v49_v8 = vpop.xlane.xlu1 %48  ;;  %v46_v9 = vpop.xlane.xlu0 %45 }
  0x99   :  { %v987_v53 = vmul.f32 0.0625, %v49_v8  ;;  %v989_v54 = vmul.f32 0.0625, %v46_v9 }
  0x9b   :  { %v182_v6 = vmul.f32 %v987_v53, %v987_v53  ;;  %v181_v7 = vmul.f32 %v989_v54, %v989_v54 }
  0x9c   :  { %v55_v12 = vpop.xlane.xlu1 %54  ;;  %v52_v13 = vpop.xlane.xlu0 %51 }
  0x9d   :  { %v995_v59 = vmul.f32 0.0625, %v55_v12  ;;  %v997_v60 = vmul.f32 0.0625, %v52_v13 }
  0x9f   :  { %v184_v9 = vmul.f32 %v995_v59, %v995_v59  ;;  %v183_v10 = vmul.f32 %v997_v60, %v997_v60 }
  0xa0   :  { %v61_v18 = vpop.xlane.xlu1 %60  ;;  %v58_v19 = vpop.xlane.xlu0 %57 }
  0xa1   :  { %v999_v61 = vmul.f32 0.0625, %v61_v18  ;;  %v1001_v0 = vmul.f32 0.0625, %v58_v19 }
  0xa3   :  { %v1016_v13 = vmul.f32 %v999_v61, %v999_v61  ;;  %v1020_v17 = vmul.f32 %v1001_v0, %v1001_v0 }
  0xa4   :  { %v950_v24 = vpop.xlane.xlu1 %66  ;;  %v952_v25 = vpop.xlane.xlu0 %63 }
  0xa5   :  { %v1012_v11 = vmul.f32 0.0625, %v950_v24  ;;  %v1023_v18 = vmul.f32 0.0625, %v952_v25 }
  0xa7   :  { %v188_v30 = vmul.f32 %v1012_v11, %v1012_v11 }
  0xa8   :  { %v955_v28 = vpop.xlane.xlu1 %72  ;;  %v957_v29 = vpop.xlane.xlu0 %69 }
  0xa9   :  { %v1026_v19 = vmul.f32 0.0625, %v955_v28  ;;  %v1031_v35 = vmul.f32 0.0625, %v957_v29 }
  0xac   :  { %v961_v32 = vpop.xlane.xlu1 %78  ;;  %v963_v33 = vpop.xlane.xlu0 %75 }
  0xb0   :  { %v118_v40 = vpop.xlane.xlu1 %117  ;;  %v115_v41 = vpop.xlane.xlu0 %114 }
  0xb1   :  { %v162_v46 = vmul.f32 0.0625, %v118_v40  ;;  %v161_v50 = vmul.f32 0.0625, %v115_v41 }
  0xb3   :  { %v194_v62 = vsub.f32 %v162_v46, %v178_v48  ;;  %v193_v1 = vsub.f32 %v161_v50, %v177_v58  ;;  %v1053_v58 = vmul.f32 %v1031_v35, %v1031_v35 }
  0xb4   :  { %v124_v51 = vpop.xlane.xlu1 %123  ;;  %v121_v52 = vpop.xlane.xlu0 %120 }
  0xb5   :  { %v164_v55 = vmul.f32 0.0625, %v124_v51  ;;  %v163_v56 = vmul.f32 0.0625, %v121_v52  ;;  %v187_v51 = vmul.f32 %v1023_v18, %v1023_v18  ;;  %v1045_v52 = vmul.f32 %v1026_v19, %v1026_v19 }
  0xb7   :  { %v196_v63 = vsub.f32 %v164_v55, %v180_v47  ;;  %v195_v2 = vsub.f32 %v163_v56, %v179_v57  ;;  %v1049_v57 = vpop.eup %769 }
  0xb8   :  { %v130_v3 = vpop.xlane.xlu1 %129  ;;  %v127_v5 = vpop.xlane.xlu0 %126 }
  0xb9   :  { %v218_v8 = vadd.f32 %v196_v63, %v194_v62  ;;  %v217_v12 = vadd.f32 %v195_v2, %v193_v1  ;;  %v166_v15 = vmul.f32 0.0625, %v130_v3  ;;  %v165_v16 = vmul.f32 0.0625, %v127_v5  ;;  %v1056_v2 = vpop.eup %771 }
  0xbb   :  { %v234_v14 = vmul.f32 0.5, %v218_v8  ;;  %v233_v20 = vmul.f32 0.5, %v217_v12  ;;  %v198_v25 = vsub.f32 %v166_v15, %v182_v6  ;;  %v197_v41 = vsub.f32 %v165_v16, %v181_v7 }
  0xbc   :  { %v136_v21 = vpop.xlane.xlu1 %135  ;;  %v133_v22 = vpop.xlane.xlu0 %132  ;;  %v1060_v8 = vmul.f32 0.0625, %v961_v32 }
  0xbd   :  { %v299_v23 = vrot.slane %v234_v14, 7  ;;  %v382_v24 = vrot.slane %v234_v14, 1  ;;  %v168_v26 = vmul.f32 0.0625, %v136_v21  ;;  %v167_v27 = vmul.f32 0.0625, %v133_v22 }
  0xbe   :  { %v295_v37 = vrot.slane %v233_v20, 7  ;;  %v378_v40 = vrot.slane %v233_v20, 1 }
  0xbf   :  { %v200_v45 = vsub.f32 %v168_v26, %v184_v9  ;;  %v199_v28 = vsub.f32 %v167_v27, %v183_v10 }
  0xc0   :  { %v303_v46 = vsel %vm246_vm1, %v295_v37, %v299_v23  ;;  %v307_v47 = vsel %vm246_vm1, %v299_v23, %v295_v37  ;;  %v386_v48 = vsel %vm329_vm2, %v378_v40, %v382_v24  ;;  %v390_v49 = vsel %vm329_vm2, %v382_v24, %v378_v40  ;;  %v142_v29 = vpop.xlane.xlu1 %141  ;;  %v139_v50 = vpop.xlane.xlu0 %138 }
  0xc1   :  { %v311_v55 = vmul.f32 %v965_v34, %v307_v47  ;;  %v312_v56 = vmul.f32 %v959_v31, %v303_v46  ;;  %v394_v62 = vmul.f32 %v975_v42, %v386_v48  ;;  %v220_v63 = vadd.f32 %v200_v45, %v198_v25 }
  0xc2   :  { %v219_v1 = vadd.f32 %v199_v28, %v197_v41  ;;  %v395_v6 = vmul.f32 %v971_v38, %v390_v49  ;;  %v170_v7 = vmul.f32 0.0625, %v142_v29  ;;  %v169_v12 = vmul.f32 0.0625, %v139_v50 }
  0xc3   :  { %v319_v3 = vadd.f32 %v311_v55, %v233_v20  ;;  %v320_v5 = vadd.f32 %v312_v56, %v234_v14  ;;  %v236_v9 = vmul.f32 0.5, %v220_v63  ;;  %v192_v50 = vmul.f32 %v1060_v8, %v1060_v8 }
  0xc4   :  { %v235_v10 = vmul.f32 0.5, %v219_v1  ;;  %v148_v15 = vpop.xlane.xlu1 %147  ;;  %v145_v16 = vpop.xlane.xlu0 %144  ;;  %v202_v40 = vsub.f32 %v170_v7, %v1016_v13  ;;  %v201_v46 = vsub.f32 %v169_v12, %v1020_v17 }
  0xc5   :  { %v402_v21 = vadd.f32 %v394_v62, %v319_v3  ;;  %v403_v22 = vadd.f32 %v395_v6, %v320_v5  ;;  %v172_v23 = vmul.f32 0.0625, %v148_v15  ;;  %v171_v24 = vmul.f32 0.0625, %v145_v16 }
  0xc6   :  { %v300_v26 = vrot.slane %v236_v9, 7  ;;  %v383_v27 = vrot.slane %v236_v9, 1  ;;  %v296_v37 = vrot.slane %v235_v10, 7  ;;  %v379_v20 = vrot.slane %v235_v10, 1 }
  0xc7   :  { %v422_v14 = vmul.f32 %v1056_v2, %v402_v21  ;;  %v204_v25 = vsub.f32 %v172_v23, %v188_v30  ;;  %v203_v32 = vsub.f32 %v171_v24, %v187_v51  ;;  %v423_v30 = vmul.f32 %v1049_v57, %v403_v22 }
  0xc8   :  { %v304_v41 = vsel %vm246_vm1, %v296_v37, %v300_v26  ;;  %v308_v45 = vsel %vm246_vm1, %v300_v26, %v296_v37  ;;  %v387_v28 = vsel %vm329_vm2, %v379_v20, %v383_v27  ;;  %v154_v47 = vpop.xlane.xlu1 %153  ;;  %v151_v48 = vpop.xlane.xlu0 %150  ;;  %v1077_v51 = vmul.f32 0.0625, %v963_v33 }
  0xc9   :  { %v430_v49 = vmax.f32 %v422_v14, 0.0  ;;  %v313_v29 = vmul.f32 %v965_v34, %v308_v45  ;;  %v314_v13 = vmul.f32 %v959_v31, %v304_v41  ;;  %v222_v55 = vadd.f32 %v204_v25, %v202_v40 }
  0xca   :  { %v221_v56 = vadd.f32 %v203_v32, %v201_v46  ;;  %v391_v17 = vsel %vm329_vm2, %v383_v27, %v379_v20  ;;  %v396_v1 = vmul.f32 %v975_v42, %v387_v28  ;;  %v174_v7 = vmul.f32 0.0625, %v154_v47 }
  0xcb   :  { %v438_v62 = vadd.f32 1e-05, %v430_v49  ;;  %v321_v63 = vadd.f32 %v313_v29, %v235_v10  ;;  %v322_v3 = vadd.f32 %v314_v13, %v236_v9  ;;  %v238_v5 = vmul.f32 0.5, %v222_v55 }
  0xcc   :  { %v237_v6 = vmul.f32 0.5, %v221_v56  ;;  %v160_v12 = vpop.xlane.xlu1 %159  ;;  %v157_v15 = vpop.xlane.xlu0 %156  ;;  %v173_v21 = vmul.f32 0.0625, %v151_v48  ;;  %v431_v33 = vmax.f32 %v423_v30, 0.0  ;;  %v397_v10 = vmul.f32 %v971_v38, %v391_v17 }
  0xcd   :  { %v404_v16 = vadd.f32 %v396_v1, %v321_v63  ;;  %v176_v22 = vmul.f32 0.0625, %v160_v12  ;;  %v301_v23 = vrot.slane %v238_v5, 7  ;;  %v384_v24 = vrot.slane %v238_v5, 1 }
  0xce   :  { %v297_v26 = vrot.slane %v237_v6, 7  ;;  %v380_v37 = vrot.slane %v237_v6, 1  ;;  %v175_v27 = vmul.f32 0.0625, %v157_v15  ;;  %773 = vrsqrt.f32 %v438_v62 }
  0xcf   :  { %v208_v14 = vsub.f32 %v176_v22, %v192_v50  ;;  %v191_v9 = vmul.f32 %v1077_v51, %v1077_v51  ;;  %v206_v25 = vsub.f32 %v174_v7, %v1045_v52  ;;  %v405_v32 = vadd.f32 %v397_v10, %v322_v3 }
  0xd0   :  { %v305_v20 = vsel %vm246_vm1, %v297_v26, %v301_v23  ;;  %v392_v40 = vsel %vm329_vm2, %v384_v24, %v380_v37  ;;  %v424_v41 = vmul.f32 %v1056_v2, %v404_v16  ;;  %v205_v28 = vsub.f32 %v173_v21, %v1053_v58  ;;  %v454_v21 = vld [vmem:[%s1518_s1] sm:$0xff] }
  0xd1   :  { %v316_v45 = vmul.f32 %v959_v31, %v305_v20  ;;  %v309_v46 = vsel %vm246_vm1, %v301_v23, %v297_v26  ;;  %v224_v47 = vadd.f32 %v208_v14, %v206_v25  ;;  %v207_v48 = vsub.f32 %v175_v27, %v191_v9 }
  0xd2   :  { %v439_v49 = vadd.f32 1e-05, %v431_v33  ;;  %v399_v13 = vmul.f32 %v971_v38, %v392_v40  ;;  %v432_v52 = vmax.f32 %v424_v41, 0.0  ;;  %v315_v55 = vmul.f32 %v965_v34, %v309_v46 }
  0xd3   :  { %v324_v29 = vadd.f32 %v316_v45, %v238_v5  ;;  %v240_v30 = vmul.f32 0.5, %v224_v47  ;;  %v223_v50 = vadd.f32 %v207_v48, %v205_v28  ;;  %v425_v58 = vmul.f32 %v1049_v57, %v405_v32  ;;  %v456_v47 = vld [vmem:[%s1518_s1 + $0x10] sm:$0xff] }
  0xd4   :  { %775 = vrsqrt.f32 %v439_v49  ;;  %v210_v5 = vadd.f32 %v968_v36, %v973_v39  ;;  %v440_v15 = vadd.f32 1e-05, %v432_v52  ;;  %v388_v16 = vsel %vm329_vm2, %v380_v37, %v384_v24 }
  0xd5   :  { %v407_v56 = vadd.f32 %v399_v13, %v324_v29  ;;  %v302_v62 = vrot.slane %v240_v30, 7  ;;  %v385_v63 = vrot.slane %v240_v30, 1  ;;  %v239_v17 = vmul.f32 0.5, %v223_v50 }
  0xd6   :  { %v323_v33 = vadd.f32 %v315_v55, %v237_v6  ;;  %v433_v10 = vmax.f32 %v425_v58, 0.0  ;;  %v209_v36 = vadd.f32 %v977_v43, %v979_v44  ;;  %v398_v37 = vmul.f32 %v975_v42, %v388_v16  ;;  %v455_v6 = vld [vmem:[%s1518_s1 + $0x8] sm:$0xff] }
  0xd7   :  { %v427_v1 = vmul.f32 %v1049_v57, %v407_v56  ;;  %v298_v3 = vrot.slane %v239_v17, 7  ;;  %v381_v7 = vrot.slane %v239_v17, 1  ;;  %v1121_v9 = vmul.f32 0.5, %v210_v5 }
  0xd8   :  { %v774_v12 = vpop.eup %773  ;;  %777 = vrsqrt.f32 %v440_v15  ;;  %v406_v44 = vadd.f32 %v398_v37, %v323_v33  ;;  %v441_v32 = vadd.f32 1e-05, %v433_v10  ;;  %v1126_v41 = vmul.f32 0.5, %v209_v36  ;;  %v459_v37 = vld [vmem:[%s1518_s1 + $0x28] sm:$0xff] }
  0xd9   :  { %v435_v22 = vmax.f32 %v427_v1, 0.0  ;;  %v306_v23 = vsel %vm246_vm1, %v298_v3, %v302_v62  ;;  %v393_v26 = vsel %vm329_vm2, %v385_v63, %v381_v7  ;;  %v310_v39 = vsel %vm246_vm1, %v302_v62, %v298_v3  ;;  %v463_v1 = vld [vmem:[%s1518_s1 + $0x48] sm:$0xff] }
  0xda   :  { %v318_v24 = vmul.f32 %v959_v31, %v306_v23  ;;  %v1116_v14 = vmul.f32 %v774_v12, %v454_v21  ;;  %v401_v40 = vmul.f32 %v971_v38, %v393_v26  ;;  %v317_v25 = vmul.f32 %v965_v34, %v310_v39 }
  0xdb   :  { %v443_v27 = vadd.f32 1e-05, %v435_v22  ;;  %v212_v46 = vadd.f32 %v995_v59, %v987_v53  ;;  %v267_v48 = vrot.slane %v1121_v9, 7  ;;  %v211_v49 = vadd.f32 %v997_v60, %v989_v54  ;;  %v457_v60 = vld [vmem:[%s1518_s1 + $0x18] sm:$0xff]  ;;  %v458_v22 = vld [vmem:[%s1518_s1 + $0x20] sm:$0xff] }
  0xdc   :  { %v326_v20 = vadd.f32 %v318_v24, %v240_v30  ;;  %536 = vperm.xlu0 %767, %v1116_v14   ;;  %v389_v29 = vsel %vm329_vm2, %v381_v7, %v385_v63  ;;  %v426_v30 = vmul.f32 %v1056_v2, %v406_v44  ;;  %v325_v50 = vadd.f32 %v317_v25, %v239_v17  ;;  %v465_v24 = vld [vmem:[%s1518_s1 + $0x58] sm:$0xff] }
  0xdd   :  { %779 = vrsqrt.f32 %v443_v27  ;;  %v263_v53 = vrot.slane %v1126_v41, 7  ;;  %v1144_v59 = vmul.f32 %v774_v12, %v456_v47  ;;  %v1146_v55 = vmul.f32 0.5, %v212_v46  ;;  %v467_v46 = vld [vmem:[%s1518_s1 + $0x68] sm:$0xff] }
  0xde   :  { %v776_v43 = vpop.eup %775  ;;  %v409_v45 = vadd.f32 %v401_v40, %v326_v20  ;;  %781 = vrsqrt.f32 %v441_v32  ;;  %v400_v54 = vmul.f32 %v975_v42, %v389_v29  ;;  %v1158_v62 = vmul.f32 0.5, %v211_v49  ;;  %v460_v29 = vld [vmem:[%s1518_s1 + $0x30] sm:$0xff] }
  0xdf   :  { %v1128_v28 = vmul.f32 %v776_v43, %v455_v6  ;;  %v271_v56 = vsel %vm246_vm1, %v263_v53, %v267_v48  ;;  %v434_v17 = vmax.f32 %v426_v30, 0.0  ;;  %v350_v7 = vrot.slane %v1121_v9, 1 }
  0xe0   :  { %v429_v13 = vmul.f32 %v1049_v57, %v409_v45  ;;  %v408_v58 = vadd.f32 %v400_v54, %v325_v50  ;;  %v1165_v12 = vmul.f32 %v776_v43, %v457_v60  ;;  %v346_v15 = vrot.slane %v1126_v41, 1 }
  0xe1   :  { %541 = vperm.xlu1 %768, %v1128_v28   ;;  %v280_v16 = vmul.f32 %v959_v31, %v271_v56  ;;  %v268_v21 = vrot.slane %v1146_v55, 7  ;;  %v264_v33 = vrot.slane %v1158_v62, 7  ;;  %v214_v23 = vadd.f32 %v1012_v11, %v999_v61 }
  0xe2   :  { %v437_v52 = vmax.f32 %v429_v13, 0.0  ;;  %v778_v3 = vpop.eup %777  ;;  %v213_v26 = vadd.f32 %v1023_v18, %v1001_v0  ;;  %v442_v36 = vadd.f32 1e-05, %v434_v17  ;;  %v428_v39 = vmul.f32 %v1056_v2, %v408_v58 }
  0xe3   :  { %v358_v61 = vsel %vm329_vm2, %v350_v7, %v346_v15  ;;  %v1191_v11 = vmul.f32 %v778_v3, %v458_v22  ;;  %v288_v18 = vadd.f32 %v280_v16, %v1121_v9  ;;  %v272_v6 = vsel %vm246_vm1, %v264_v33, %v268_v21 }
  0xe4   :  { %v445_v63 = vadd.f32 1e-05, %v437_v52  ;;  %v1204_v27 = vmul.f32 0.5, %v214_v23  ;;  %v1206_v20 = vmul.f32 0.5, %v213_v26  ;;  %v363_v43 = vmul.f32 %v971_v38, %v358_v61  ;;  %v462_v61 = vld [vmem:[%s1518_s1 + $0x40] sm:$0xff] }
  0xe5   :  { %546 = vperm.xlu1 %768, %v1144_v59   ;;  %v436_v44 = vmax.f32 %v428_v39, 0.0  ;;  %v351_v25 = vrot.slane %v1146_v55, 1  ;;  %v347_v32 = vrot.slane %v1158_v62, 1  ;;  %v282_v49 = vmul.f32 %v959_v31, %v272_v6 }
  0xe6   :  { %783 = vrsqrt.f32 %v445_v63  ;;  %v371_v47 = vadd.f32 %v363_v43, %v288_v18  ;;  %v269_v30 = vrot.slane %v1204_v27, 7  ;;  %v265_v50 = vrot.slane %v1206_v20, 7 }
  0xe7   :  { %v780_v5 = vpop.eup %779  ;;  %785 = vrsqrt.f32 %v442_v36  ;;  %v216_v52 = vadd.f32 %v1060_v8, %v1026_v19  ;;  %v215_v54 = vadd.f32 %v1077_v51, %v1031_v35  ;;  %v444_v60 = vadd.f32 1e-05, %v436_v44  ;;  %v469_v19 = vld [vmem:[%s1518_s1 + $0x78] sm:$0xff]  ;;  %v487_v36 = vld [vmem:[%s1519_s2 + $0x8] sm:$0xff] }
  0xe8   :  { %v1179_v10 = vmul.f32 %v780_v5, %v463_v1  ;;  %v782_v0 = vpop.eup %781  ;;  %v1209_v40 = vmul.f32 %v780_v5, %v465_v24  ;;  %v359_v63 = vsel %vm329_vm2, %v351_v25, %v347_v32  ;;  %v1236_v17 = vmul.f32 %v778_v3, %v460_v29  ;;  %v461_v35 = vld [vmem:[%s1518_s1 + $0x38] sm:$0xff] }
  0xe9   :  { %551 = vperm.xlu1 %768, %v1165_v12   ;;  %v475_v45 = vmul.f32 %v782_v0, %v459_v37  ;;  %v415_v8 = vmul.f32 %v1049_v57, %v371_v47  ;;  %v290_v51 = vadd.f32 %v282_v49, %v1146_v55  ;;  %v275_v58 = vsel %vm246_vm1, %v267_v48, %v263_v53  ;;  %v489_v47 = vld [vmem:[%s1519_s2 + $0x18] sm:$0xff]  ;;  %v464_v49 = vld [vmem:[%s1518_s1 + $0x50] sm:$0xff] }
  0xea   :  { %581 = vperm.xlu0 %767, %v1179_v10   ;;  %v273_v1 = vsel %vm246_vm1, %v265_v50, %v269_v30  ;;  %v1259_v3 = vmul.f32 0.5, %v216_v52  ;;  %v1261_v5 = vmul.f32 0.5, %v215_v54  ;;  %787 = vrsqrt.f32 %v444_v60 }
  0xeb   :  { %v503_v22 = vmul.f32 %v1128_v28, %v415_v8  ;;  %v365_v48 = vmul.f32 %v971_v38, %v359_v63  ;;  %v352_v53 = vrot.slane %v1204_v27, 1  ;;  %v348_v23 = vrot.slane %v1206_v20, 1 }
  0xec   :  { %v477_v26 = vmul.f32 %v782_v0, %v461_v35  ;;  %v284_v24 = vmul.f32 %v959_v31, %v273_v1  ;;  %v279_v18 = vmul.f32 %v965_v34, %v275_v58  ;;  %v270_v37 = vrot.slane %v1259_v3, 7 }
  0xed   :  { %556 = vperm.xlu1 %768, %v1191_v11   ;;  %v373_v28 = vadd.f32 %v365_v48, %v290_v51  ;;  %v266_v0 = vrot.slane %v1261_v5, 7  ;;  %v519_v6 = vsub.f32 %v487_v36, %v503_v22  ;;  %v505_v43 = vmul.f32 %v1165_v12, %v415_v8 }
  0xee   :  { %591 = vperm.xlu0 %767, %v1209_v40   ;;  %v360_v44 = vsel %vm329_vm2, %v352_v53, %v348_v23  ;;  %v354_v12 = vsel %vm329_vm2, %v346_v15, %v350_v7  ;;  %v287_v7 = vadd.f32 %v279_v18, %v1126_v41  ;;  %v276_v15 = vsel %vm246_vm1, %v268_v21, %v264_v33  ;;  %v491_v41 = vld [vmem:[%s1519_s2 + $0x28] sm:$0xff]  ;;  %v466_v21 = vld [vmem:[%s1518_s1 + $0x60] sm:$0xff] }
  0xef   :  { %v417_v29 = vmul.f32 %v1049_v57, %v373_v28  ;;  %v274_v9 = vsel %vm246_vm1, %v266_v0, %v270_v37  ;;  %v521_v52 = vsub.f32 %v489_v47, %v505_v43  ;;  %v367_v60 = vmul.f32 %v971_v38, %v360_v44 }
  0xf0   :  { %v784_v13 = vpop.eup %783  ;;  %v353_v63 = vrot.slane %v1259_v3, 1  ;;  %v362_v8 = vmul.f32 %v975_v42, %v354_v12  ;;  %v286_v58 = vmul.f32 %v959_v31, %v274_v9  ;;  %v495_v12 = vld [vmem:[%s1519_s2 + $0x48] sm:$0xff]  ;;  %v497_v9 = vld [vmem:[%s1519_s2 + $0x58] sm:$0xff] }
  0xf1   :  { %561 = vperm.xlu1 %768, %v475_v45   ;;  %v1228_v56 = vmul.f32 %v784_v13, %v467_v46  ;;  %v1264_v16 = vmul.f32 %v784_v13, %v469_v19  ;;  %v786_v39 = vpop.eup %785  ;;  %v292_v13 = vadd.f32 %v284_v24, %v1204_v27  ;;  %v507_v54 = vmul.f32 %v475_v45, %v417_v29  ;;  %v468_v24 = vld [vmem:[%s1518_s1 + $0x70] sm:$0xff] }
  0xf2   :  { %v1288_v46 = vmul.f32 %v786_v39, %v462_v61  ;;  %v349_v19 = vrot.slane %v1261_v5, 1  ;;  %v1321_v35 = vmul.f32 %v786_v39, %v464_v49  ;;  %v281_v45 = vmul.f32 %v965_v34, %v276_v15  ;;  %v493_v39 = vld [vmem:[%s1519_s2 + $0x38] sm:$0xff]  ;;  %v486_v49 = vld [vmem:[%s1519_s2] sm:$0xff]  ;;  %v488_v15 = vld [vmem:[%s1519_s2 + $0x10] sm:$0xff] }
  0xf3   :  { %601 = vperm.xlu0 %767, %v1228_v56   ;;  %v375_v33 = vadd.f32 %v367_v60, %v292_v13  ;;  %v370_v1 = vadd.f32 %v362_v8, %v287_v7  ;;  %v523_v22 = vsub.f32 %v491_v41, %v507_v54  ;;  %v509_v48 = vmul.f32 %v477_v26, %v417_v29  ;;  %v490_v41 = vld [vmem:[%s1519_s2 + $0x20] sm:$0xff] }
  0xf4   :  { %v788_v51 = vpop.eup %787  ;;  %v361_v31 = vsel %vm329_vm2, %v353_v63, %v349_v19  ;;  %v294_v28 = vadd.f32 %v286_v58, %v1259_v3  ;;  %v289_v18 = vadd.f32 %v281_v45, %v1158_v62  ;;  %v356_v7 = vsel %vm329_vm2, %v348_v23, %v352_v53 }
  0xf5   :  { %566 = vperm.xlu1 %768, %v1236_v17   ;;  %v1339_v36 = vmul.f32 %v788_v51, %v466_v21  ;;  %v419_v61 = vmul.f32 %v1049_v57, %v375_v33  ;;  %v414_v55 = vmul.f32 %v1056_v2, %v370_v1  ;;  %v369_v43 = vmul.f32 %v971_v38, %v361_v31  ;;  %v498_v31 = vld [vmem:[%s1519_s2 + $0x60] sm:$0xff] }
  0xf6   :  { %v484_v47 = vmul.f32 %v788_v51, %v468_v24  ;;  %v278_v27 = vsel %vm246_vm1, %v270_v37, %v266_v0  ;;  %v366_v54 = vmul.f32 %v975_v42, %v356_v7  ;;  %v357_v21 = vsel %vm329_vm2, %v349_v19, %v353_v63 }
  0xf7   :  { %611 = vperm.xlu0 %767, %v1264_v16   ;;  %v502_v62 = vmul.f32 %v1116_v14, %v414_v55  ;;  %v513_v29 = vmul.f32 %v1209_v40, %v419_v61  ;;  %v504_v14 = vmul.f32 %v1144_v59, %v414_v55  ;;  %v285_v37 = vmul.f32 %v965_v34, %v278_v27 }
  0xf8   :  { %v368_v45 = vmul.f32 %v975_v42, %v357_v21 }
  0xf9   :  { %571 = vperm.xlu1 %768, %v477_v26   ;;  %v355_v26 = vsel %vm329_vm2, %v347_v32, %v351_v25  ;;  %v277_v25 = vsel %vm246_vm1, %v269_v30, %v265_v50  ;;  %v525_v32 = vsub.f32 %v493_v39, %v509_v48  ;;  %v377_v30 = vadd.f32 %v369_v43, %v294_v28 }
  0xfa   :  { %v364_v44 = vmul.f32 %v975_v42, %v355_v26  ;;  %v518_v13 = vsub.f32 %v486_v49, %v502_v62  ;;  %v529_v53 = vsub.f32 %v497_v9, %v513_v29  ;;  %v520_v60 = vsub.f32 %v488_v15, %v504_v14  ;;  %v791_v9 = vld [vmem:[%s1517_s0 + $0x28] sm:$0xff] }
  0xfb   :  { %637 = vperm.xlu0 %767, %v519_v6   ;;  %v511_v6 = vmul.f32 %v1179_v10, %v419_v61  ;;  %v283_v10 = vmul.f32 %v965_v34, %v277_v25  ;;  %v421_v40 = vmul.f32 %v1049_v57, %v377_v30  ;;  %v492_v34 = vld [vmem:[%s1519_s2 + $0x30] sm:$0xff] }
  0xfc   :  { %v372_v50 = vadd.f32 %v364_v44, %v289_v18 }
  0xfd   :  { %576 = vperm.xlu1 %768, %v1288_v46   ;;  %v527_v38 = vsub.f32 %v495_v12, %v511_v6  ;;  %v291_v59 = vadd.f32 %v283_v10, %v1206_v20  ;;  %v515_v23 = vmul.f32 %v1228_v56, %v421_v40  ;;  %v499_v20 = vld [vmem:[%s1519_s2 + $0x68] sm:$0xff]  ;;  %v517_v56 = vmul.f32 %v1264_v16, %v421_v40  ;;  %v790_v10 = vld [vmem:[%s1517_s0 + $0x18] sm:$0xff] }
  0xfe   :  { %v293_v16 = vadd.f32 %v285_v37, %v1261_v5  ;;  %v496_v5 = vld [vmem:[%s1519_s2 + $0x50] sm:$0xff] }
  0xff   :  { %647 = vperm.xlu0 %767, %v521_v52   ;;  %v416_v52 = vmul.f32 %v1056_v2, %v372_v50  ;;  %v374_v8 = vadd.f32 %v366_v54, %v291_v59  ;;  %v531_v0 = vsub.f32 %v499_v20, %v515_v23  ;;  %v794_v20 = vld [vmem:[%s1517_s0] sm:$0xff] }
 0x100   :  { %v376_v63 = vadd.f32 %v368_v45, %v293_v16  ;;  %v797_v45 = vld [vmem:[%s1517_s0 + $0x68] sm:$0xff] }
 0x101   :  { %586 = vperm.xlu1 %768, %v1321_v35   ;;  %v506_v57 = vmul.f32 %v1191_v11, %v416_v52  ;;  %v508_v58 = vmul.f32 %v1236_v17, %v416_v52  ;;  %v501_v11 = vld [vmem:[%s1519_s2 + $0x78] sm:$0xff]  ;;  %v418_v17 = vmul.f32 %v1056_v2, %v374_v8 }
 0x102   :  { %v533_v33 = vsub.f32 %v501_v11, %v517_v56  ;;  %v420_v42 = vmul.f32 %v1056_v2, %v376_v63  ;;  %v792_v52 = vld [vmem:[%s1517_s0 + $0x38] sm:$0xff]  ;;  %v796_v11 = vld [vmem:[%s1517_s0 + $0x10] sm:$0xff] }
 0x103   :  { %657 = vperm.xlu0 %767, %v523_v22   ;;  %v522_v51 = vsub.f32 %v490_v41, %v506_v57  ;;  %v524_v1 = vsub.f32 %v492_v34, %v508_v58  ;;  %v510_v3 = vmul.f32 %v1288_v46, %v418_v17  ;;  %v512_v22 = vmul.f32 %v1321_v35, %v418_v17  ;;  %v500_v35 = vld [vmem:[%s1519_s2 + $0x70] sm:$0xff]  ;;  %s747_s2 = sshll.u32 %s831_s27, 4  ;;  %s748_s2 = int_to_ptr.vmem [resolvable:$true] %s747_s2 }
 0x104   :  { %v514_v46 = vmul.f32 %v1339_v36, %v420_v42  ;;  %v516_v26 = vmul.f32 %v484_v47, %v420_v42  ;;  %v799_v42 = vld [vmem:[%s1517_s0 + $0x78] sm:$0xff]  ;;  %s805_s1 = scalar_lea.vmem %s748_s2, 2048  ;;  %p810_p1 = scmp.lt.s32.totalorder %s748_s2, %s748_s2 }
 0x105   :  { %596 = vperm.xlu1 %768, %v1339_v36   ;;  %v526_v19 = vsub.f32 %v494_v4, %v510_v3  ;;  %v528_v48 = vsub.f32 %v496_v5, %v512_v22  ;;  %v798_v3 = vld [vmem:[%s1517_s0 + $0x20] sm:$0xff]  ;;  %p806_p0 = scmp.ne.s32.totalorder %s748_s2, %s805_s1  ;;  %p811_p2 = scmp.lt.s32.totalorder %s805_s1, %s805_s1 }
 0x106   :  { %v530_v39 = vsub.f32 %v498_v31, %v514_v46  ;;  %v532_v24 = vsub.f32 %v500_v35, %v516_v26  ;;  %v800_v46 = vld [vmem:[%s1517_s0 + $0x30] sm:$0xff] }
 0x107   :  { %667 = vperm.xlu0 %767, %v525_v32   ;;  %p812_p3 = por %p811_p2, %p810_p1 }
 0x109   :  { %606 = vperm.xlu1 %768, %v484_v47   ;;  %v789_v47 = vld [vmem:[%s1517_s0 + $0x8] sm:$0xff]  ;;  %p813_p4 = pnand %p812_p3, %p806_p0 }
 0x10b   :  { %677 = vperm.xlu0 %767, %v527_v38  }
 0x10d   :  { %632 = vperm.xlu1 %768, %v518_v13  }
 0x10f   :  { %687 = vperm.xlu0 %767, %v529_v53  }
 0x111   :  { %642 = vperm.xlu1 %768, %v520_v60   ;;  %v793_v60 = vld [vmem:[%s1517_s0 + $0x48] sm:$0xff] }
 0x113   :  { %697 = vperm.xlu0 %767, %v531_v0  }
 0x115   :  { %652 = vperm.xlu1 %768, %v522_v51   ;;  %v795_v51 = vld [vmem:[%s1517_s0 + $0x58] sm:$0xff] }
 0x117   :  { %707 = vperm.xlu0 %767, %v533_v33  }
 0x119   :  { %662 = vperm.xlu1 %768, %v524_v1  }
 0x11d   :  { %672 = vperm.xlu1 %768, %v526_v19  }
 0x121   :  { %682 = vperm.xlu1 %768, %v528_v48  }
 0x125   :  { %692 = vperm.xlu1 %768, %v530_v39  }
 0x129   :  { %702 = vperm.xlu1 %768, %v532_v24  }
 0x15b   :  { %v537_v2 = vpop.permute.xlu0 %536 }
 0x15c   :  { %v614_v41 = vmul.f32 %v794_v20, %v537_v2 }
 0x160   :  { %v542_v61 = vpop.permute.xlu1 %541 }
 0x161   :  { %v615_v12 = vmul.f32 %v789_v47, %v542_v61  ;;  %v801_v61 = vld [vmem:[%s1517_s0 + $0x40] sm:$0xff]  ;;  %v804_v47 = vld [vmem:[%s1517_s0 + $0x70] sm:$0xff] }
 0x164   :  { %v547_v28 = vpop.permute.xlu1 %546 }
 0x165   :  { %v616_v21 = vmul.f32 %v796_v11, %v547_v28 }
 0x168   :  { %v552_v18 = vpop.permute.xlu1 %551 }
 0x169   :  { %v582_v55 = vpop.permute.xlu0 %581  ;;  %v617_v38 = vmul.f32 %v790_v10, %v552_v18 }
 0x16a   :  { %v623_v57 = vmul.f32 %v793_v60, %v582_v55  ;;  %v802_v55 = vld [vmem:[%s1517_s0 + $0x50] sm:$0xff] }
 0x16c   :  { %v557_v36 = vpop.permute.xlu1 %556 }
 0x16d   :  { %v592_v25 = vpop.permute.xlu0 %591  ;;  %v618_v4 = vmul.f32 %v798_v3, %v557_v36 }
 0x16e   :  { %v625_v58 = vmul.f32 %v795_v51, %v592_v25 }
 0x170   :  { %v562_v32 = vpop.permute.xlu1 %561 }
 0x171   :  { %v619_v7 = vmul.f32 %v791_v9, %v562_v32 }
 0x172   :  { %v602_v6 = vpop.permute.xlu0 %601 }
 0x173   :  { %v627_v1 = vmul.f32 %v797_v45, %v602_v6  ;;  %v803_v6 = vld [vmem:[%s1517_s0 + $0x60] sm:$0xff] }
 0x174   :  { %v567_v43 = vpop.permute.xlu1 %566 }
 0x175   :  { %v620_v31 = vmul.f32 %v800_v46, %v567_v43 }
 0x176   :  { %v612_v44 = vpop.permute.xlu0 %611 }
 0x177   :  { %v629_v48 = vmul.f32 %v799_v42, %v612_v44 }
 0x178   :  { %v572_v62 = vpop.permute.xlu1 %571 }
 0x179   :  { %v621_v27 = vmul.f32 %v792_v52, %v572_v62 }
 0x17a   :  { %v638_v49 = vpop.permute.xlu0 %637 }
 0x17b   :  { %v711_v50 = vadd.f32 %v638_v49, %v615_v12 }
 0x17c   :  { %v577_v30 = vpop.permute.xlu1 %576 }
 0x17d   :  { %727 = vst.msk [vmem:[#allocation2 + $0x8] sm:$0xff] %vm31_vm0, %v711_v50  ;;  %v622_v28 = vmul.f32 %v801_v61, %v577_v30 }
 0x17e   :  { %v648_v29 = vpop.permute.xlu0 %647 }
 0x17f   :  { %v713_v14 = vadd.f32 %v648_v29, %v617_v38 }
 0x180   :  { %v587_v13 = vpop.permute.xlu1 %586 }
 0x181   :  { %729 = vst.msk [vmem:[#allocation2 + $0x18] sm:$0xff] %vm31_vm0, %v713_v14  ;;  %v624_v36 = vmul.f32 %v802_v55, %v587_v13 }
 0x182   :  { %v658_v15 = vpop.permute.xlu0 %657 }
 0x183   :  { %v715_v59 = vadd.f32 %v658_v15, %v619_v7 }
 0x184   :  { %v597_v40 = vpop.permute.xlu1 %596 }
 0x185   :  { %731 = vst.msk [vmem:[#allocation2 + $0x28] sm:$0xff] %vm31_vm0, %v715_v59  ;;  %v626_v43 = vmul.f32 %v803_v6, %v597_v40 }
 0x186   :  { %v668_v53 = vpop.permute.xlu0 %667 }
 0x187   :  { %v717_v54 = vadd.f32 %v668_v53, %v621_v27 }
 0x188   :  { %v607_v23 = vpop.permute.xlu1 %606 }
 0x189   :  { %733 = vst.msk [vmem:[#allocation2 + $0x38] sm:$0xff] %vm31_vm0, %v717_v54  ;;  %v628_v12 = vmul.f32 %v804_v47, %v607_v23 }
 0x18a   :  { %v678_v8 = vpop.permute.xlu0 %677 }
 0x18b   :  { %v719_v0 = vadd.f32 %v678_v8, %v623_v57 }
 0x18c   :  { %v633_v37 = vpop.permute.xlu1 %632 }
 0x18d   :  { %v710_v56 = vadd.f32 %v633_v37, %v614_v41  ;;  %735 = vst.msk [vmem:[#allocation2 + $0x48] sm:$0xff] %vm31_vm0, %v719_v0 }
 0x18e   :  { %v688_v34 = vpop.permute.xlu0 %687 }
 0x18f   :  { %726 = vst.msk [vmem:[#allocation2] sm:$0xff] %vm31_vm0, %v710_v56  ;;  %v721_v17 = vadd.f32 %v688_v34, %v625_v58 }
 0x190   :  { %v643_v16 = vpop.permute.xlu1 %642 }
 0x191   :  { %v712_v33 = vadd.f32 %v643_v16, %v616_v21  ;;  %737 = vst.msk [vmem:[#allocation2 + $0x58] sm:$0xff] %vm31_vm0, %v721_v17 }
 0x192   :  { %v698_v63 = vpop.permute.xlu0 %697 }
 0x193   :  { %728 = vst.msk [vmem:[#allocation2 + $0x10] sm:$0xff] %vm31_vm0, %v712_v33  ;;  %v723_v22 = vadd.f32 %v698_v63, %v627_v1 }
 0x194   :  { %v653_v19 = vpop.permute.xlu1 %652 }
 0x195   :  { %v714_v5 = vadd.f32 %v653_v19, %v618_v4  ;;  %739 = vst.msk [vmem:[#allocation2 + $0x68] sm:$0xff] %vm31_vm0, %v723_v22 }
 0x196   :  { %v708_v39 = vpop.permute.xlu0 %707 }
 0x197   :  { %730 = vst.msk [vmem:[#allocation2 + $0x20] sm:$0xff] %vm31_vm0, %v714_v5  ;;  %v725_v35 = vadd.f32 %v708_v39, %v629_v48 }
 0x198   :  { %v663_v26 = vpop.permute.xlu1 %662 }
 0x199   :  { %v716_v24 = vadd.f32 %v663_v26, %v620_v31  ;;  %741 = vst.msk [vmem:[#allocation2 + $0x78] sm:$0xff] %vm31_vm0, %v725_v35 }
 0x19b   :  { %732 = vst.msk [vmem:[#allocation2 + $0x30] sm:$0xff] %vm31_vm0, %v716_v24 }
 0x19c   :  { %v673_v2 = vpop.permute.xlu1 %672 }
 0x19d   :  { %v718_v18 = vadd.f32 %v673_v2, %v622_v28 }
 0x19f   :  { %734 = vst.msk [vmem:[#allocation2 + $0x40] sm:$0xff] %vm31_vm0, %v718_v18 }
 0x1a0   :  { %v683_v25 = vpop.permute.xlu1 %682 }
 0x1a1   :  { %v720_v32 = vadd.f32 %v683_v25, %v624_v36 }
 0x1a3   :  { %736 = vst.msk [vmem:[#allocation2 + $0x50] sm:$0xff] %vm31_vm0, %v720_v32 }
 0x1a4   :  { %v693_v44 = vpop.permute.xlu1 %692 }
 0x1a5   :  { %v722_v62 = vadd.f32 %v693_v44, %v626_v43 }
 0x1a7   :  { %738 = vst.msk [vmem:[#allocation2 + $0x60] sm:$0xff] %vm31_vm0, %v722_v62 }
 0x1a8   :  { %v703_v49 = vpop.permute.xlu1 %702 }
 0x1a9   :  { %v724_v30 = vadd.f32 %v703_v49, %v628_v12 }
 0x1ab   :  { %740 = vst.msk [vmem:[#allocation2 + $0x70] sm:$0xff] %vm31_vm0, %v724_v30 }
 0x1ac   :  { %816 = shalt.err (!%p813_p4)
}
 0x1ad   :  { %s817_s5 = scalar_lea.hbm %s1520_s3, 2048 }
 0x1ae   :  { %p818_p5 = scmp.ne.s32.totalorder %s1520_s3, %s817_s5  ;;  %p821_p6 = scmp.lt.u32.totalorder %s817_s5, %s1520_s3 }
 0x1b0   :  { %p823_p7 = pnand %p821_p6, %p818_p5 }
 0x1b2   :  { %826 = shalt.err (!%p823_p7)
}
 0x1b3   :  { %s832_s9 = smov 128   ;;  %s833_s10 = smov 8  }
 0x1b4   :  { %753 = dma.vmem_to_hbm [thread:$0]  %s748_s2, 2048, %s1520_s3, [#allocation3], %s832_s9, %s832_s9, %s833_s10  }
 0x1b5   :  { %827 = dma.done.wait [#allocation3], 2048  }
 0x1b6   :  { %828 = vsyncadd [#allocation3], 4294965248 }
 0x1b7   :  { %757 = vsyncpa [#allocation3], 1 }

</bundles_post_ra>
